<compile_context>
chip_gen: v7x
topology: tpu7x:2x2x1
jax: 0.10.0
libtpu: 0.0.40
codegen_flags: <defaults>
</compile_context>

<pallas_src>
import functools

import jax
import jax.numpy as jnp
from jax.experimental import pallas as pl
from jax.experimental.pallas import tpu as pltpu

_VMEM_BUDGET = 40 * 1024 * 1024  # conservative resident budget (v7x: 64 MiB physical)


def _round_up(x, m):
    return ((x + m - 1) // m) * m


def _mlp_fused_kernel(*refs, num_hidden):
    """refs = (x, w0, b0, ..., w_{H-1}, b_{H-1}, w_last_row, b_last, out).

    x:          (bt, D_in)      bf16 or f32
    w_i:        (D_i, D_{i+1})  bf16 or f32 (MXU operands)
    b_i:        (1, D_{i+1})    f32
    w_last_row: (1, D_H)        f32 (final D_H -> 1 weight, lane-dense)
    b_last:     (1, 1)          f32
    out:        (1, 1, bt)      f32 (per-row probability, batch in the lane axis)
    """
    x_ref = refs[0]
    o_ref = refs[-1]
    p_refs = refs[1:-1]

    h = x_ref[...]
    for i in range(num_hidden):
        w = p_refs[2 * i][...]
        b = p_refs[2 * i + 1][...]
        # MXU matmul with f32 accumulation; operands may be bf16 (v6e/v7x fast path).
        y = jnp.dot(h.astype(w.dtype), w, preferred_element_type=jnp.float32)
        h = jnp.maximum(y + b, 0.0)            # f32 bias add + ReLU on the VPU
        if i + 1 < num_hidden:
            h = h.astype(w.dtype)              # keep inter-layer activations in MXU dtype

    # Final (D_H -> 1) layer as a trans-B dot: (1, D_H) x (bt, D_H)^T -> (1, bt).
    # Per-row logits land lane-dense, so the output store is one unmasked (1, bt)
    # row (4 B/row of HBM writeback) instead of a 128-wide broadcast slab.
    w_last = p_refs[2 * num_hidden][...]       # (1, D_H) f32
    b_last = p_refs[2 * num_hidden + 1][...]   # (1, 1)  f32
    logit = jax.lax.dot_general(
        w_last, h.astype(jnp.float32),
        dimension_numbers=(((1,), (1,)), ((), ())),
        preferred_element_type=jnp.float32,
    ) + b_last                                 # (1, bt)
    prob = jax.nn.sigmoid(logit)
    o_ref[...] = prob.reshape(o_ref.shape).astype(o_ref.dtype)


def _derive_tiling(batch, d_in, x_itemsize, param_bytes, max_width, align, batch_tile):
    """Return (bt, padded_batch)."""
    if batch_tile is not None:
        bt = max(align, _round_up(batch_tile, align))
        return bt, _round_up(batch, bt)

    # Cap for vreg/spill pressure (v5e: 64 x 4 KiB vregs, single vst slot)...
    max_tile = 512 if max_width < 128 else 256
    # ...and against a conservative VMEM budget (v7x has only 64 MiB physical VMEM):
    # resident params (x2 to stay valid in the double-buffered fallback) plus
    # double-buffered input tile plus double-buffered (1, bt) output tile.
    per_row = 2 * d_in * x_itemsize + 2 * 4
    while max_tile > align and 2 * param_bytes + max_tile * per_row > _VMEM_BUDGET:
        max_tile //= 2
    max_tile = max(align, max_tile)

    padded = _round_up(batch, align)
    if padded <= max_tile:
        if batch >= 2 * align:
            # >= 2 tiles so the "parallel" grid axis actually feeds both v7x TensorCores.
            padded = _round_up(batch, 2 * align)
            return padded // 2, padded
        return padded, padded

    # Multi-tile: largest tile <= max_tile whose padding waste stays small
    # (avoids the old round-up-to-a-full-512-tile jnp.pad copy).
    for cand in range(max_tile, align - 1, -align):
        p = _round_up(batch, cand)
        if p - batch <= max(64, p // 16):
            return cand, p
    return align, _round_up(batch, align)


def flexible_alzheimer_net(x, params, *, batch_tile=None, use_bf16_mxu=True):
    """Forward pass of FlexibleAlzheimerNet as a single fused Pallas call.

    params: list of (w: (d_in, d_out) f32, b: (1, d_out) f32); last layer has d_out == 1.
    Returns (batch, 1) f32 probabilities.
    """
    batch, d_in = x.shape
    num_hidden = len(params) - 1
    assert params[-1][0].shape[1] == 1, "final layer must map to a single output"

    compute_dtype = jnp.bfloat16 if use_bf16_mxu else jnp.float32
    x_itemsize = 2 if use_bf16_mxu else 4
    align = 16 if use_bf16_mxu else 8          # sublane alignment (bf16 packs 16 rows/vreg)

    # ---- parameter operands (resident, untiled) ------------------------------
    param_ops = []
    for li in range(num_hidden):
        w, b = params[li]
        param_ops.append(w.astype(compute_dtype))
        param_ops.append(b.reshape(1, -1).astype(jnp.float32))
    w_last, b_last = params[-1]
    param_ops.append(w_last.reshape(1, -1).astype(jnp.float32))   # (1, D_H) lane-dense
    param_ops.append(b_last.reshape(1, 1).astype(jnp.float32))
    param_bytes = sum(int(p.size) * p.dtype.itemsize for p in param_ops)
    # TODO(synk): if resident params ever exceed the VMEM budget, K-tile the largest
    # weight via a second grid axis / pltpu.emit_pipeline instead of only shrinking bt.

    # ---- batch tiling ---------------------------------------------------------
    max_width = max([d_in] + [p[0].shape[1] for p in params[:-1]])
    bt, padded_batch = _derive_tiling(batch, d_in, x_itemsize, param_bytes,
                                      max_width, align, batch_tile)
    num_tiles = padded_batch // bt

    x = x.astype(compute_dtype)                # bf16 mode: halves kernel input reads
    if padded_batch != batch:
        x = jnp.pad(x, ((0, padded_batch - batch), (0, 0)))

    # ---- explicit VMEM budget (defaults: 16 MiB v5e / 32 MiB v6e,v7x) ---------
    vmem_needed = 2 * param_bytes + 2 * bt * d_in * x_itemsize + 2 * bt * 4
    vmem_limit = min(max(int(1.25 * vmem_needed) + (1 << 20), 32 << 20), 64 << 20)

    kernel = functools.partial(_mlp_fused_kernel, num_hidden=num_hidden)

    def _call(single_buffer_params):
        def _param_spec(shape):
            if single_buffer_params:
                # Constant-index residents: single-buffered (no pointless double-buffer).
                return pl.BlockSpec(shape, lambda i: (0, 0), pipeline_mode=pl.Buffered(1))
            return pl.BlockSpec(shape, lambda i: (0, 0))

        in_specs = [pl.BlockSpec((bt, d_in), lambda i: (i, 0))]
        in_specs += [_param_spec(p.shape) for p in param_ops]
        return pl.pallas_call(
            kernel,
            out_shape=jax.ShapeDtypeStruct((num_tiles, 1, bt), jnp.float32),
            grid=(num_tiles,),
            in_specs=in_specs,
            out_specs=pl.BlockSpec((1, 1, bt), lambda i: (i, 0, 0)),
            compiler_params=pltpu.CompilerParams(
                dimension_semantics=("parallel",),   # shard batch tiles across v7x TCs
                vmem_limit_bytes=vmem_limit,
            ),
        )(x, *param_ops)

    try:
        out = _call(single_buffer_params=True)
    except Exception:
        # This jax/Mosaic build rejected pl.Buffered(1); fall back to default
        # double-buffered parameter specs (costs only extra VMEM).
        out = _call(single_buffer_params=False)

    return out.reshape(padded_batch)[:batch].reshape(batch, 1)


def init_params(key, input_dim, layer_sizes):
    """Deterministic init mirroring nn.Linear's default U(-1/sqrt(fan_in), 1/sqrt(fan_in)).

    Weights stored (d_in, d_out) (transposed vs torch) and biases as (1, d_out)."""
    params = []
    dims = [input_dim] + list(layer_sizes) + [1]
    for i in range(len(dims) - 1):
        d_in, d_out = dims[i], dims[i + 1]
        key, kw, kb = jax.random.split(key, 3)
        bound = 1.0 / jnp.sqrt(jnp.float32(d_in))
        w = jax.random.uniform(kw, (d_in, d_out), jnp.float32, -bound, bound)
        b = jax.random.uniform(kb, (1, d_out), jnp.float32, -bound, bound)
        params.append((w, b))
    return params


def flexible_alzheimer_net_ref(x, params, *, use_bf16_mxu=False):
    """Pure-JAX reference. use_bf16_mxu=True mirrors the kernel's bf16 MXU operands."""
    h = x.astype(jnp.float32)
    n = len(params)
    for i, (w, b) in enumerate(params):
        if use_bf16_mxu and i < n - 1:
            y = jnp.dot(h.astype(jnp.bfloat16), w.astype(jnp.bfloat16),
                        preferred_element_type=jnp.float32) + b
        else:
            y = jnp.dot(h, w, precision=jax.lax.Precision.HIGHEST,
                        preferred_element_type=jnp.float32) + b
        h = jax.nn.sigmoid(y) if i == n - 1 else jnp.maximum(y, 0.0)
    return h


if __name__ == "__main__":
    key = jax.random.PRNGKey(0)
    k_params, k_x = jax.random.split(key)

    batch = 8
    input_dim = 32
    layer_sizes = [64, 32]

    params = init_params(k_params, input_dim, layer_sizes)
    x = jax.random.normal(k_x, (batch, input_dim), jnp.float32)

    # f32 MXU path vs f32 (HIGHEST precision) reference.
    out_f32 = jax.block_until_ready(flexible_alzheimer_net(x, params, use_bf16_mxu=False))
    ref_f32 = flexible_alzheimer_net_ref(x, params)
    assert out_f32.shape == (batch, 1), out_f32.shape
    assert jnp.allclose(out_f32, ref_f32, atol=1e-3, rtol=1e-3), "f32 path mismatch vs reference"

    # bf16-MXU path (default on v6e/v7x): close to a bf16-operand reference and within
    # bf16 rounding of the f32 reference.
    out_bf16 = jax.block_until_ready(flexible_alzheimer_net(x, params, use_bf16_mxu=True))
    ref_bf16 = flexible_alzheimer_net_ref(x, params, use_bf16_mxu=True)
    assert out_bf16.shape == (batch, 1), out_bf16.shape
    assert jnp.allclose(out_bf16, ref_bf16, atol=2e-3, rtol=2e-3), "bf16 path mismatch vs bf16 reference"
    assert jnp.allclose(out_bf16, ref_f32, atol=3e-2, rtol=3e-2), "bf16 path drifted from f32 reference"

    print("KERNEL_OK")
</pallas_src>

<mosaic_0001>
module attributes {stable_mosaic.version = 11 : i64} {
  func.func @_mlp_fused_kernel(%arg0: i32, %arg1: memref<8x32xf32, #tpu.memory_space<vmem>>, %arg2: memref<32x64xf32, #tpu.memory_space<vmem>>, %arg3: memref<1x64xf32, #tpu.memory_space<vmem>>, %arg4: memref<64x32xf32, #tpu.memory_space<vmem>>, %arg5: memref<1x32xf32, #tpu.memory_space<vmem>>, %arg6: memref<1x32xf32, #tpu.memory_space<vmem>>, %arg7: memref<1x1xf32, #tpu.memory_space<vmem>>, %arg8: memref<1x1x8xf32, #tpu.memory_space<vmem>>) attributes {dimension_semantics = [#tpu.dimension_semantics<parallel>], iteration_bounds = array<i64: 1>, scalar_prefetch = 0 : i64, scratch_operands = 0 : i64, tpu.core_type = #tpu.core_type<tc>, window_params = [{transform_indices = @transform_0, window_bounds = array<i64: 8, 32>}, {pipeline_mode = #tpu.pipeline_mode<synchronous>, transform_indices = @transform_1, window_bounds = array<i64: 32, 64>}, {pipeline_mode = #tpu.pipeline_mode<synchronous>, transform_indices = @transform_2, window_bounds = array<i64: 1, 64>}, {pipeline_mode = #tpu.pipeline_mode<synchronous>, transform_indices = @transform_3, window_bounds = array<i64: 64, 32>}, {pipeline_mode = #tpu.pipeline_mode<synchronous>, transform_indices = @transform_4, window_bounds = array<i64: 1, 32>}, {pipeline_mode = #tpu.pipeline_mode<synchronous>, transform_indices = @transform_5, window_bounds = array<i64: 1, 32>}, {pipeline_mode = #tpu.pipeline_mode<synchronous>, transform_indices = @transform_6, window_bounds = array<i64: 1, 1>}, {transform_indices = @transform_7, window_bounds = array<i64: 1, 1, 8>}]} {
    %c0 = arith.constant 0 : index
    %c0_0 = arith.constant 0 : index
    %0 = vector.load %arg1[%c0, %c0_0] : memref<8x32xf32, #tpu.memory_space<vmem>>, vector<8x32xf32>
    %c0_1 = arith.constant 0 : index
    %c0_2 = arith.constant 0 : index
    %1 = vector.load %arg2[%c0_1, %c0_2] : memref<32x64xf32, #tpu.memory_space<vmem>>, vector<32x64xf32>
    %c0_3 = arith.constant 0 : index
    %c0_4 = arith.constant 0 : index
    %2 = vector.load %arg3[%c0_3, %c0_4] : memref<1x64xf32, #tpu.memory_space<vmem>>, vector<1x64xf32>
    %cst = arith.constant dense<0.000000e+00> : vector<8x64xf32>
    %3 = tpu.matmul %0, %1, %cst {dimension_numbers = #tpu.dot_dimension_numbers<[1], [0], [0], [1], [0, 0, 1, 1], [], []>} : vector<8x32xf32>, vector<32x64xf32>, vector<8x64xf32> -> vector<8x64xf32>
    %4 = vector.broadcast %2 : vector<1x64xf32> to vector<8x64xf32>
    %5 = arith.addf %3, %4 : vector<8x64xf32>
    %cst_5 = arith.constant 0.000000e+00 : f32
    %6 = vector.broadcast %cst_5 : f32 to vector<8x64xf32>
    %7 = arith.maximumf %5, %6 : vector<8x64xf32>
    %c0_6 = arith.constant 0 : index
    %c0_7 = arith.constant 0 : index
    %8 = vector.load %arg4[%c0_6, %c0_7] : memref<64x32xf32, #tpu.memory_space<vmem>>, vector<64x32xf32>
    %c0_8 = arith.constant 0 : index
    %c0_9 = arith.constant 0 : index
    %9 = vector.load %arg5[%c0_8, %c0_9] : memref<1x32xf32, #tpu.memory_space<vmem>>, vector<1x32xf32>
    %cst_10 = arith.constant dense<0.000000e+00> : vector<8x32xf32>
    %10 = tpu.matmul %7, %8, %cst_10 {dimension_numbers = #tpu.dot_dimension_numbers<[1], [0], [0], [1], [0, 0, 1, 1], [], []>} : vector<8x64xf32>, vector<64x32xf32>, vector<8x32xf32> -> vector<8x32xf32>
    %11 = vector.broadcast %9 : vector<1x32xf32> to vector<8x32xf32>
    %12 = arith.addf %10, %11 : vector<8x32xf32>
    %cst_11 = arith.constant 0.000000e+00 : f32
    %13 = vector.broadcast %cst_11 : f32 to vector<8x32xf32>
    %14 = arith.maximumf %12, %13 : vector<8x32xf32>
    %c0_12 = arith.constant 0 : index
    %c0_13 = arith.constant 0 : index
    %15 = vector.load %arg6[%c0_12, %c0_13] : memref<1x32xf32, #tpu.memory_space<vmem>>, vector<1x32xf32>
    %c0_14 = arith.constant 0 : index
    %c0_15 = arith.constant 0 : index
    %16 = vector.load %arg7[%c0_14, %c0_15] : memref<1x1xf32, #tpu.memory_space<vmem>>, vector<1x1xf32>
    %cst_16 = arith.constant dense<0.000000e+00> : vector<1x8xf32>
    %17 = tpu.matmul %15, %14, %cst_16 {dimension_numbers = #tpu.dot_dimension_numbers<[1], [1], [0], [0], [0, 0, 1, 0], [], []>} : vector<1x32xf32>, vector<8x32xf32>, vector<1x8xf32> -> vector<1x8xf32>
    %18 = vector.broadcast %16 : vector<1x1xf32> to vector<1x8xf32>
    %19 = arith.addf %17, %18 : vector<1x8xf32>
    %20 = arith.negf %19 : vector<1x8xf32>
    %21 = math.exp %20 : vector<1x8xf32>
    %cst_17 = arith.constant 1.000000e+00 : f32
    %22 = vector.broadcast %cst_17 : f32 to vector<1x8xf32>
    %23 = arith.addf %22, %21 : vector<1x8xf32>
    %24 = arith.divf %22, %23 : vector<1x8xf32>
    %25 = vector.shape_cast %24 : vector<1x8xf32> to vector<1x1x8xf32>
    %c0_18 = arith.constant 0 : index
    %c0_19 = arith.constant 0 : index
    %c0_20 = arith.constant 0 : index
    %26 = vector.load %arg8[%c0_18, %c0_19, %c0_20] : memref<1x1x8xf32, #tpu.memory_space<vmem>>, vector<1x1x8xf32>
    tpu.vector_store %arg8[%c0_18, %c0_19, %c0_20], %25 {strides = array<i32>} : memref<1x1x8xf32, #tpu.memory_space<vmem>>, vector<1x1x8xf32>,
    return
  }
  func.func @transform_0(%arg0: i32) -> (i32, i32) {
    %c0_i32 = arith.constant 0 : i32
    %c0_i32_0 = arith.constant 0 : i32
    return %arg0, %c0_i32 : i32, i32
  }
  func.func @transform_1(%arg0: i32) -> (i32, i32) {
    %c0_i32 = arith.constant 0 : i32
    %c0_i32_0 = arith.constant 0 : i32
    %c0_i32_1 = arith.constant 0 : i32
    return %c0_i32, %c0_i32_0 : i32, i32
  }
  func.func @transform_2(%arg0: i32) -> (i32, i32) {
    %c0_i32 = arith.constant 0 : i32
    %c0_i32_0 = arith.constant 0 : i32
    %c0_i32_1 = arith.constant 0 : i32
    return %c0_i32, %c0_i32_0 : i32, i32
  }
  func.func @transform_3(%arg0: i32) -> (i32, i32) {
    %c0_i32 = arith.constant 0 : i32
    %c0_i32_0 = arith.constant 0 : i32
    %c0_i32_1 = arith.constant 0 : i32
    return %c0_i32, %c0_i32_0 : i32, i32
  }
  func.func @transform_4(%arg0: i32) -> (i32, i32) {
    %c0_i32 = arith.constant 0 : i32
    %c0_i32_0 = arith.constant 0 : i32
    %c0_i32_1 = arith.constant 0 : i32
    return %c0_i32, %c0_i32_0 : i32, i32
  }
  func.func @transform_5(%arg0: i32) -> (i32, i32) {
    %c0_i32 = arith.constant 0 : i32
    %c0_i32_0 = arith.constant 0 : i32
    %c0_i32_1 = arith.constant 0 : i32
    return %c0_i32, %c0_i32_0 : i32, i32
  }
  func.func @transform_6(%arg0: i32) -> (i32, i32) {
    %c0_i32 = arith.constant 0 : i32
    %c0_i32_0 = arith.constant 0 : i32
    %c0_i32_1 = arith.constant 0 : i32
    return %c0_i32, %c0_i32_0 : i32, i32
  }
  func.func @transform_7(%arg0: i32) -> (i32, i32, i32) {
    %c0_i32 = arith.constant 0 : i32
    %c0_i32_0 = arith.constant 0 : i32
    %c0_i32_1 = arith.constant 0 : i32
    return %arg0, %c0_i32, %c0_i32_0 : i32, i32, i32
  }
}

module attributes {stable_mosaic.version = 11 : i64} {
  func.func @_mlp_fused_kernel(%arg0: i32, %arg1: memref<8x32xf32, #tpu.memory_space<vmem>>, %arg2: memref<32x64xf32, #tpu.memory_space<vmem>>, %arg3: memref<1x64xf32, #tpu.memory_space<vmem>>, %arg4: memref<64x32xf32, #tpu.memory_space<vmem>>, %arg5: memref<1x32xf32, #tpu.memory_space<vmem>>, %arg6: memref<1x32xf32, #tpu.memory_space<vmem>>, %arg7: memref<1x1xf32, #tpu.memory_space<vmem>>, %arg8: memref<1x1x8xf32, #tpu.memory_space<vmem>>) attributes {dimension_semantics = [#tpu.dimension_semantics<parallel>], iteration_bounds = array<i64: 1>, scalar_prefetch = 0 : i64, scratch_operands = 0 : i64, tpu.core_type = #tpu.core_type<tc>, window_params = [{transform_indices = @transform_0, window_bounds = array<i64: 8, 32>}, {pipeline_mode = #tpu.pipeline_mode<synchronous>, transform_indices = @transform_1, window_bounds = array<i64: 32, 64>}, {pipeline_mode = #tpu.pipeline_mode<synchronous>, transform_indices = @transform_2, window_bounds = array<i64: 1, 64>}, {pipeline_mode = #tpu.pipeline_mode<synchronous>, transform_indices = @transform_3, window_bounds = array<i64: 64, 32>}, {pipeline_mode = #tpu.pipeline_mode<synchronous>, transform_indices = @transform_4, window_bounds = array<i64: 1, 32>}, {pipeline_mode = #tpu.pipeline_mode<synchronous>, transform_indices = @transform_5, window_bounds = array<i64: 1, 32>}, {pipeline_mode = #tpu.pipeline_mode<synchronous>, transform_indices = @transform_6, window_bounds = array<i64: 1, 1>}, {transform_indices = @transform_7, window_bounds = array<i64: 1, 1, 8>}]} {
    %c0 = arith.constant 0 : index
    %c0_0 = arith.constant 0 : index
    %0 = vector.load %arg1[%c0, %c0_0] : memref<8x32xf32, #tpu.memory_space<vmem>>, vector<8x32xf32>
    %c0_1 = arith.constant 0 : index
    %c0_2 = arith.constant 0 : index
    %1 = vector.load %arg2[%c0_1, %c0_2] : memref<32x64xf32, #tpu.memory_space<vmem>>, vector<32x64xf32>
    %c0_3 = arith.constant 0 : index
    %c0_4 = arith.constant 0 : index
    %2 = vector.load %arg3[%c0_3, %c0_4] : memref<1x64xf32, #tpu.memory_space<vmem>>, vector<1x64xf32>
    %cst = arith.constant dense<0.000000e+00> : vector<8x64xf32>
    %3 = tpu.matmul %0, %1, %cst {dimension_numbers = #tpu.dot_dimension_numbers<[1], [0], [0], [1], [0, 0, 1, 1], [], []>} : vector<8x32xf32>, vector<32x64xf32>, vector<8x64xf32> -> vector<8x64xf32>
    %4 = vector.broadcast %2 : vector<1x64xf32> to vector<8x64xf32>
    %5 = arith.addf %3, %4 : vector<8x64xf32>
    %cst_5 = arith.constant 0.000000e+00 : f32
    %6 = vector.broadcast %cst_5 : f32 to vector<8x64xf32>
    %7 = arith.maximumf %5, %6 : vector<8x64xf32>
    %c0_6 = arith.constant 0 : index
    %c0_7 = arith.constant 0 : index
    %8 = vector.load %arg4[%c0_6, %c0_7] : memref<64x32xf32, #tpu.memory_space<vmem>>, vector<64x32xf32>
    %c0_8 = arith.constant 0 : index
    %c0_9 = arith.constant 0 : index
    %9 = vector.load %arg5[%c0_8, %c0_9] : memref<1x32xf32, #tpu.memory_space<vmem>>, vector<1x32xf32>
    %cst_10 = arith.constant dense<0.000000e+00> : vector<8x32xf32>
    %10 = tpu.matmul %7, %8, %cst_10 {dimension_numbers = #tpu.dot_dimension_numbers<[1], [0], [0], [1], [0, 0, 1, 1], [], []>} : vector<8x64xf32>, vector<64x32xf32>, vector<8x32xf32> -> vector<8x32xf32>
    %11 = vector.broadcast %9 : vector<1x32xf32> to vector<8x32xf32>
    %12 = arith.addf %10, %11 : vector<8x32xf32>
    %cst_11 = arith.constant 0.000000e+00 : f32
    %13 = vector.broadcast %cst_11 : f32 to vector<8x32xf32>
    %14 = arith.maximumf %12, %13 : vector<8x32xf32>
    %c0_12 = arith.constant 0 : index
    %c0_13 = arith.constant 0 : index
    %15 = vector.load %arg6[%c0_12, %c0_13] : memref<1x32xf32, #tpu.memory_space<vmem>>, vector<1x32xf32>
    %c0_14 = arith.constant 0 : index
    %c0_15 = arith.constant 0 : index
    %16 = vector.load %arg7[%c0_14, %c0_15] : memref<1x1xf32, #tpu.memory_space<vmem>>, vector<1x1xf32>
    %cst_16 = arith.constant dense<0.000000e+00> : vector<1x8xf32>
    %17 = tpu.matmul %15, %14, %cst_16 {dimension_numbers = #tpu.dot_dimension_numbers<[1], [1], [0], [0], [0, 0, 1, 0], [], []>} : vector<1x32xf32>, vector<8x32xf32>, vector<1x8xf32> -> vector<1x8xf32>
    %18 = vector.broadcast %16 : vector<1x1xf32> to vector<1x8xf32>
    %19 = arith.addf %17, %18 : vector<1x8xf32>
    %20 = arith.negf %19 : vector<1x8xf32>
    %21 = math.exp %20 : vector<1x8xf32>
    %cst_17 = arith.constant 1.000000e+00 : f32
    %22 = vector.broadcast %cst_17 : f32 to vector<1x8xf32>
    %23 = arith.addf %22, %21 : vector<1x8xf32>
    %24 = arith.divf %22, %23 : vector<1x8xf32>
    %25 = vector.shape_cast %24 : vector<1x8xf32> to vector<1x1x8xf32>
    %c0_18 = arith.constant 0 : index
    %c0_19 = arith.constant 0 : index
    %c0_20 = arith.constant 0 : index
    %26 = vector.load %arg8[%c0_18, %c0_19, %c0_20] : memref<1x1x8xf32, #tpu.memory_space<vmem>>, vector<1x1x8xf32>
    tpu.vector_store %arg8[%c0_18, %c0_19, %c0_20], %25 {strides = array<i32>} : memref<1x1x8xf32, #tpu.memory_space<vmem>>, vector<1x1x8xf32>,
    return
  }
  func.func @transform_0(%arg0: i32) -> (i32, i32) {
    %c0_i32 = arith.constant 0 : i32
    %c0_i32_0 = arith.constant 0 : i32
    return %arg0, %c0_i32 : i32, i32
  }
  func.func @transform_1(%arg0: i32) -> (i32, i32) {
    %c0_i32 = arith.constant 0 : i32
    %c0_i32_0 = arith.constant 0 : i32
    %c0_i32_1 = arith.constant 0 : i32
    return %c0_i32, %c0_i32_0 : i32, i32
  }
  func.func @transform_2(%arg0: i32) -> (i32, i32) {
    %c0_i32 = arith.constant 0 : i32
    %c0_i32_0 = arith.constant 0 : i32
    %c0_i32_1 = arith.constant 0 : i32
    return %c0_i32, %c0_i32_0 : i32, i32
  }
  func.func @transform_3(%arg0: i32) -> (i32, i32) {
    %c0_i32 = arith.constant 0 : i32
    %c0_i32_0 = arith.constant 0 : i32
    %c0_i32_1 = arith.constant 0 : i32
    return %c0_i32, %c0_i32_0 : i32, i32
  }
  func.func @transform_4(%arg0: i32) -> (i32, i32) {
    %c0_i32 = arith.constant 0 : i32
    %c0_i32_0 = arith.constant 0 : i32
    %c0_i32_1 = arith.constant 0 : i32
    return %c0_i32, %c0_i32_0 : i32, i32
  }
  func.func @transform_5(%arg0: i32) -> (i32, i32) {
    %c0_i32 = arith.constant 0 : i32
    %c0_i32_0 = arith.constant 0 : i32
    %c0_i32_1 = arith.constant 0 : i32
    return %c0_i32, %c0_i32_0 : i32, i32
  }
  func.func @transform_6(%arg0: i32) -> (i32, i32) {
    %c0_i32 = arith.constant 0 : i32
    %c0_i32_0 = arith.constant 0 : i32
    %c0_i32_1 = arith.constant 0 : i32
    return %c0_i32, %c0_i32_0 : i32, i32
  }
  func.func @transform_7(%arg0: i32) -> (i32, i32, i32) {
    %c0_i32 = arith.constant 0 : i32
    %c0_i32_0 = arith.constant 0 : i32
    %c0_i32_1 = arith.constant 0 : i32
    return %arg0, %c0_i32, %c0_i32_0 : i32, i32, i32
  }
}

</mosaic_0001>

<bundles_post_ra>
// kernel: tpu_custom_call.1
= control target key start
LH: loop header
LB: loop body
LE: loop exit
PB: predicated region body
PF: predicated region fallthrough
CT: control target
= control target key end

     0   :  { %s539_s0 = inlined_call_operand.vmem [shape: f32[8,32], index: 0, kind: input, shape index: {}]   ;;  %s540_s1 = inlined_call_operand.vmem [shape: f32[32,64], index: 1, kind: input, shape index: {}]   ;;  %s541_s2 = inlined_call_operand.vmem [shape: f32[1,64], index: 2, kind: input, shape index: {}]   ;;  %s542_s3 = inlined_call_operand.vmem [shape: f32[64,32], index: 3, kind: input, shape index: {}]   ;;  %s543_s4 = inlined_call_operand.vmem [shape: f32[1,32], index: 4, kind: input, shape index: {}]   ;;  %s544_s5 = inlined_call_operand.vmem [shape: f32[1,32], index: 5, kind: input, shape index: {}]   ;;  %s545_s6 = inlined_call_operand.<no memory space> [shape: f32[1,1], index: 6, kind: input, shape index: {}]   ;;  %s546_s7 = inlined_call_operand.hbm [shape: f32[1,1,8], index: 7, kind: output, shape index: {}]  }
   0x1   :  { %v12_v0 = vstv %s545_s6 }
   0x2   :  { %13 = vst [vmem:[#allocation2] sm:$0x1] %v12_v0 }
   0x3   :  { %v30_v1 = vld [vmem:[%s540_s1] sm:$0xff]  ;;  %v31_v2 = vld [vmem:[%s540_s1 + $0x8] sm:$0xff]  ;;  %v32_v3 = vld [vmem:[%s540_s1 + $0x10] sm:$0xff]  ;;  %v425_v4 = vmov 0.0|0.0   ;;  %vm426_vm0 = vmmov 0   ;;  %v427_v7 = vmov 0.0  }
   0x4   :  { %373 = vmatprep.subr.bf16.mxu0 %v425_v4  ;;  %v374_v5 = vpack.c.bf16 %v31_v2, %v30_v1  ;;  %v33_v6 = vld [vmem:[%s540_s1 + $0x18] sm:$0xff]  ;;  %346 = vmatprep.mubr.msk.f32.mxu0 %vm426_vm0, %v427_v7  ;;  %v116_v8 = vld [vmem:[%s542_s3] sm:$0xff]  ;;  %v117_v9 = vld [vmem:[%s542_s3 + $0x8] sm:$0xff] }
   0x5   :  { %379 = vmatprep.subr.bf16.mxu1 %v425_v4  ;;  %v118_v10 = vld [vmem:[%s542_s3 + $0x10] sm:$0xff]  ;;  %v119_v11 = vld [vmem:[%s542_s3 + $0x18] sm:$0xff]  ;;  %365 = vmatprep.mubr.msk.f32.mxu1 %vm426_vm0, %v427_v7  ;;  %v377_v12 = vpack.c.bf16 %v33_v6, %v32_v3  ;;  %v380_v13 = vpack.c.bf16 %v117_v9, %v116_v8 }
   0x6   :  { %375 = vmatpush3.bf16.msra.mxu0 %v374_v5 }
   0x7   :  { %376 = vmatprep.subr.bf16.mxu0 %v425_v4 }
   0x8   :  { %14 = vsyncpa [#allocation4], 0  ;;  %381 = vmatpush3.bf16.msra.mxu1 %v380_v13  ;;  %v383_v14 = vpack.c.bf16 %v119_v11, %v118_v10  ;;  %v120_v15 = vld [vmem:[%s542_s3 + $0x20] sm:$0xff]  ;;  %v121_v16 = vld [vmem:[%s542_s3 + $0x28] sm:$0xff]  ;;  %vm41_vm1 = vcmask 261120   ;;  %vm131_vm2 = vcmask 523264   ;;  %v213_v35 = vlaneseq }
   0x9   :  { %382 = vmatprep.subr.bf16.mxu1 %v425_v4  ;;  %v29_v17 = vld [vmem:[%s539_s0] sm:$0xff]  ;;  %v386_v18 = vpack.c.bf16 %v121_v16, %v120_v15  ;;  %v122_v19 = vld [vmem:[%s542_s3 + $0x30] sm:$0xff]  ;;  %v123_v20 = vld [vmem:[%s542_s3 + $0x38] sm:$0xff]  ;;  %v428_v28 = vmov 0   ;;  %vm299_vm3 = vcmask 57344  }
   0xa   :  { %378 = vmatpush3.bf16.msra.mxu0 %v377_v12  ;;  %v389_v21 = vpack.c.bf16 %v123_v20, %v122_v19  ;;  %v315_v22 = vld [vmem:[%s541_s2] ss:$0 sm:$0xff]  ;;  %396 = vset.pattern.permute.xlu0 %v428_v28  ;;  %v214_v36 = vshrl.u32 %v213_v35, 7 }
   0xb   :  { %368 = vmatprep.subr.mxu0 %v427_v7  ;;  %v207_v27 = vld [vmem:[#allocation2] sm:$0x1] }
   0xc   :  { %384 = vmatpush3.bf16.msra.mxu1 %v383_v14  ;;  %210 = vperm.xlu0 %396, %v207_v27   ;;  %v317_v29 = vld [vmem:[%s543_s4] ss:$0 sm:$0xff]  ;;  %v215_v37 = vsub.s32 0, %v214_v36  ;;  %s429_s4 = smov [#allocation3]  }
   0xd   :  { %347 = vmatmul.mubr.msk.f32.vlgmr.msra.gmra.mrb[0].mxu0 %vm41_vm1, %v29_v17  ;;  %385 = vmatprep.subr.bf16.mxu1 %v425_v4  ;;  %v206_v34 = vld [vmem:[%s544_s5] sm:$0x1]  ;;  %s307_s30 = sshll.u32 %s429_s4, 4  ;;  %s308_s30 = int_to_ptr.vmem [resolvable:$true] %s307_s30 }
   0xe   :  { %370 = vmatprep.mubr.msk.f32.mxu0 %vm426_vm0, %v427_v7  ;;  %s401_s5 = scalar_lea.vmem %s308_s30, 16  ;;  %s405_s8 = scalar_lea.vmem %s308_s30, 32 }
   0xf   :  { %p402_p0 = scmp.ne.s32.totalorder %s308_s30, %s401_s5  ;;  %p406_p1 = scmp.lt.s32.totalorder %s308_s30, %s308_s30 }
  0x10   :  { %387 = vmatpush3.bf16.msra.mxu1 %v386_v18  ;;  %p407_p2 = scmp.lt.s32.totalorder %s405_s8, %s401_s5 }
  0x11   :  { %388 = vmatprep.subr.bf16.mxu1 %v425_v4 }
  0x12   :  { %p408_p3 = por %p407_p2, %p406_p1 }
  0x14   :  { %390 = vmatpush3.bf16.msra.mxu1 %v389_v21  ;;  %p409_p4 = pnand %p408_p3, %p402_p0 }
  0x8b   :  { %v211_v38 = vpop.permute.xlu0 %210 }
  0x8c   :  { %v216_v39 = vrot.slane %v211_v38, %v215_v37 }
  0xe0   :  { %v111_v23 = vpop.f32.mrb[0].mxu0 }
  0xe1   :  { %v112_v24 = vadd.f32 %v315_v22, %v111_v23  ;;  %v348_v25 = vpop.f32.mrb[1].mxu0 }
  0xe3   :  { %v115_v26 = vmax.f32 %v112_v24, 0.0 }
  0xe5   :  { %366 = vmatmul.mubr.msk.f32.vlgmr.msra.gmra.mrb[0].mxu1 %vm131_vm2, %v115_v26 }
 0x1b8   :  { %v201_v30 = vpop.f32.mrb[0].mxu1 }
 0x1b9   :  { %v202_v31 = vadd.f32 %v317_v29, %v201_v30  ;;  %v367_v32 = vpop.f32.mrb[1].mxu1 }
 0x1bb   :  { %v205_v33 = vmax.f32 %v202_v31, 0.0 }
 0x1bd   :  { %369 = vmatpush3.xpose.msk.msra.mxu0 %vm41_vm1, %v205_v33 }
 0x1c0   :  { %371 = vmatmul.mubr.msk.f32.vlgmr.msra.gmra.mrb[2].mxu0 %vm41_vm1, %v206_v34 }
 0x293   :  { %v289_v40 = vpop.f32.mrb[2].mxu0 }
 0x294   :  { %v290_v41 = vadd.f32 %v289_v40, %v216_v39  ;;  %v372_v42 = vpop.f32.mrb[3].mxu0 }
 0x296   :  { %v321_v43 = vmul.f32 -1.442695, %v290_v41 }
 0x298   :  { %397 = vpow2.f32 %v321_v43 }
 0x2a2   :  { %v398_v44 = vpop.eup %397 }
 0x2a3   :  { %v296_v45 = vadd.f32 1.0, %v398_v44 }
 0x2a5   :  { %399 = vrcp.f32 %v296_v45 }
 0x2af   :  { %v400_v46 = vpop.eup %399 }
 0x2b0   :  { %300 = vst.msk [vmem:[#allocation3] sm:$0x1] %vm299_vm3, %v400_v46 }
 0x2b1   :  { %412 = shalt.err (!%p409_p4)
}
 0x2b2   :  { %s413_s6 = scalar_lea.hbm %s546_s7, 16 }
 0x2b3   :  { %p414_p5 = scmp.ne.s32.totalorder %s546_s7, %s413_s6  ;;  %p417_p6 = scmp.lt.u32.totalorder %s413_s6, %s546_s7 }
 0x2b5   :  { %p419_p7 = pnand %p417_p6, %p414_p5 }
 0x2b7   :  { %422 = shalt.err (!%p419_p7)
}
 0x2b8   :  { %310 = dma.vmem_to_hbm [thread:$0]  %s308_s30, 16, %s546_s7, [#allocation4]  }
 0x2b9   :  { %423 = dma.done.wait [#allocation4], 16  }
 0x2ba   :  { %424 = vsyncadd [#allocation4], 4294967280 }
 0x2bb   :  { %314 = vsyncpa [#allocation4], 1 }

// kernel: tpu_custom_call.1
= control target key start
LH: loop header
LB: loop body
LE: loop exit
PB: predicated region body
PF: predicated region fallthrough
CT: control target
= control target key end

     0   :  { %s539_s0 = inlined_call_operand.vmem [shape: f32[8,32], index: 0, kind: input, shape index: {}]   ;;  %s540_s1 = inlined_call_operand.vmem [shape: f32[32,64], index: 1, kind: input, shape index: {}]   ;;  %s541_s2 = inlined_call_operand.vmem [shape: f32[1,64], index: 2, kind: input, shape index: {}]   ;;  %s542_s3 = inlined_call_operand.vmem [shape: f32[64,32], index: 3, kind: input, shape index: {}]   ;;  %s543_s4 = inlined_call_operand.vmem [shape: f32[1,32], index: 4, kind: input, shape index: {}]   ;;  %s544_s5 = inlined_call_operand.vmem [shape: f32[1,32], index: 5, kind: input, shape index: {}]   ;;  %s545_s6 = inlined_call_operand.<no memory space> [shape: f32[1,1], index: 6, kind: input, shape index: {}]   ;;  %s546_s7 = inlined_call_operand.hbm [shape: f32[1,1,8], index: 7, kind: output, shape index: {}]  }
   0x1   :  { %v12_v0 = vstv %s545_s6 }
   0x2   :  { %13 = vst [vmem:[#allocation2] sm:$0x1] %v12_v0 }
   0x3   :  { %v30_v1 = vld [vmem:[%s540_s1] sm:$0xff]  ;;  %v31_v2 = vld [vmem:[%s540_s1 + $0x8] sm:$0xff]  ;;  %v32_v3 = vld [vmem:[%s540_s1 + $0x10] sm:$0xff]  ;;  %v425_v4 = vmov 0.0|0.0   ;;  %vm426_vm0 = vmmov 0   ;;  %v427_v7 = vmov 0.0  }
   0x4   :  { %373 = vmatprep.subr.bf16.mxu0 %v425_v4  ;;  %v374_v5 = vpack.c.bf16 %v31_v2, %v30_v1  ;;  %v33_v6 = vld [vmem:[%s540_s1 + $0x18] sm:$0xff]  ;;  %346 = vmatprep.mubr.msk.f32.mxu0 %vm426_vm0, %v427_v7  ;;  %v116_v8 = vld [vmem:[%s542_s3] sm:$0xff]  ;;  %v117_v9 = vld [vmem:[%s542_s3 + $0x8] sm:$0xff] }
   0x5   :  { %379 = vmatprep.subr.bf16.mxu1 %v425_v4  ;;  %v118_v10 = vld [vmem:[%s542_s3 + $0x10] sm:$0xff]  ;;  %v119_v11 = vld [vmem:[%s542_s3 + $0x18] sm:$0xff]  ;;  %365 = vmatprep.mubr.msk.f32.mxu1 %vm426_vm0, %v427_v7  ;;  %v377_v12 = vpack.c.bf16 %v33_v6, %v32_v3  ;;  %v380_v13 = vpack.c.bf16 %v117_v9, %v116_v8 }
   0x6   :  { %375 = vmatpush3.bf16.msra.mxu0 %v374_v5 }
   0x7   :  { %376 = vmatprep.subr.bf16.mxu0 %v425_v4 }
   0x8   :  { %14 = vsyncpa [#allocation4], 0  ;;  %381 = vmatpush3.bf16.msra.mxu1 %v380_v13  ;;  %v383_v14 = vpack.c.bf16 %v119_v11, %v118_v10  ;;  %v120_v15 = vld [vmem:[%s542_s3 + $0x20] sm:$0xff]  ;;  %v121_v16 = vld [vmem:[%s542_s3 + $0x28] sm:$0xff]  ;;  %vm41_vm1 = vcmask 261120   ;;  %vm131_vm2 = vcmask 523264   ;;  %v213_v35 = vlaneseq }
   0x9   :  { %382 = vmatprep.subr.bf16.mxu1 %v425_v4  ;;  %v29_v17 = vld [vmem:[%s539_s0] sm:$0xff]  ;;  %v386_v18 = vpack.c.bf16 %v121_v16, %v120_v15  ;;  %v122_v19 = vld [vmem:[%s542_s3 + $0x30] sm:$0xff]  ;;  %v123_v20 = vld [vmem:[%s542_s3 + $0x38] sm:$0xff]  ;;  %v428_v28 = vmov 0   ;;  %vm299_vm3 = vcmask 57344  }
   0xa   :  { %378 = vmatpush3.bf16.msra.mxu0 %v377_v12  ;;  %v389_v21 = vpack.c.bf16 %v123_v20, %v122_v19  ;;  %v315_v22 = vld [vmem:[%s541_s2] ss:$0 sm:$0xff]  ;;  %396 = vset.pattern.permute.xlu0 %v428_v28  ;;  %v214_v36 = vshrl.u32 %v213_v35, 7 }
   0xb   :  { %368 = vmatprep.subr.mxu0 %v427_v7  ;;  %v207_v27 = vld [vmem:[#allocation2] sm:$0x1] }
   0xc   :  { %384 = vmatpush3.bf16.msra.mxu1 %v383_v14  ;;  %210 = vperm.xlu0 %396, %v207_v27   ;;  %v317_v29 = vld [vmem:[%s543_s4] ss:$0 sm:$0xff]  ;;  %v215_v37 = vsub.s32 0, %v214_v36  ;;  %s429_s4 = smov [#allocation3]  }
   0xd   :  { %347 = vmatmul.mubr.msk.f32.vlgmr.msra.gmra.mrb[0].mxu0 %vm41_vm1, %v29_v17  ;;  %385 = vmatprep.subr.bf16.mxu1 %v425_v4  ;;  %v206_v34 = vld [vmem:[%s544_s5] sm:$0x1]  ;;  %s307_s30 = sshll.u32 %s429_s4, 4  ;;  %s308_s30 = int_to_ptr.vmem [resolvable:$true] %s307_s30 }
   0xe   :  { %370 = vmatprep.mubr.msk.f32.mxu0 %vm426_vm0, %v427_v7  ;;  %s401_s5 = scalar_lea.vmem %s308_s30, 16  ;;  %s405_s8 = scalar_lea.vmem %s308_s30, 32 }
   0xf   :  { %p402_p0 = scmp.ne.s32.totalorder %s308_s30, %s401_s5  ;;  %p406_p1 = scmp.lt.s32.totalorder %s308_s30, %s308_s30 }
  0x10   :  { %387 = vmatpush3.bf16.msra.mxu1 %v386_v18  ;;  %p407_p2 = scmp.lt.s32.totalorder %s405_s8, %s401_s5 }
  0x11   :  { %388 = vmatprep.subr.bf16.mxu1 %v425_v4 }
  0x12   :  { %p408_p3 = por %p407_p2, %p406_p1 }
  0x14   :  { %390 = vmatpush3.bf16.msra.mxu1 %v389_v21  ;;  %p409_p4 = pnand %p408_p3, %p402_p0 }
  0x8b   :  { %v211_v38 = vpop.permute.xlu0 %210 }
  0x8c   :  { %v216_v39 = vrot.slane %v211_v38, %v215_v37 }
  0xe0   :  { %v111_v23 = vpop.f32.mrb[0].mxu0 }
  0xe1   :  { %v112_v24 = vadd.f32 %v315_v22, %v111_v23  ;;  %v348_v25 = vpop.f32.mrb[1].mxu0 }
  0xe3   :  { %v115_v26 = vmax.f32 %v112_v24, 0.0 }
  0xe5   :  { %366 = vmatmul.mubr.msk.f32.vlgmr.msra.gmra.mrb[0].mxu1 %vm131_vm2, %v115_v26 }
 0x1b8   :  { %v201_v30 = vpop.f32.mrb[0].mxu1 }
 0x1b9   :  { %v202_v31 = vadd.f32 %v317_v29, %v201_v30  ;;  %v367_v32 = vpop.f32.mrb[1].mxu1 }
 0x1bb   :  { %v205_v33 = vmax.f32 %v202_v31, 0.0 }
 0x1bd   :  { %369 = vmatpush3.xpose.msk.msra.mxu0 %vm41_vm1, %v205_v33 }
 0x1c0   :  { %371 = vmatmul.mubr.msk.f32.vlgmr.msra.gmra.mrb[2].mxu0 %vm41_vm1, %v206_v34 }
 0x293   :  { %v289_v40 = vpop.f32.mrb[2].mxu0 }
 0x294   :  { %v290_v41 = vadd.f32 %v289_v40, %v216_v39  ;;  %v372_v42 = vpop.f32.mrb[3].mxu0 }
 0x296   :  { %v321_v43 = vmul.f32 -1.442695, %v290_v41 }
 0x298   :  { %397 = vpow2.f32 %v321_v43 }
 0x2a2   :  { %v398_v44 = vpop.eup %397 }
 0x2a3   :  { %v296_v45 = vadd.f32 1.0, %v398_v44 }
 0x2a5   :  { %399 = vrcp.f32 %v296_v45 }
 0x2af   :  { %v400_v46 = vpop.eup %399 }
 0x2b0   :  { %300 = vst.msk [vmem:[#allocation3] sm:$0x1] %vm299_vm3, %v400_v46 }
 0x2b1   :  { %412 = shalt.err (!%p409_p4)
}
 0x2b2   :  { %s413_s6 = scalar_lea.hbm %s546_s7, 16 }
 0x2b3   :  { %p414_p5 = scmp.ne.s32.totalorder %s546_s7, %s413_s6  ;;  %p417_p6 = scmp.lt.u32.totalorder %s413_s6, %s546_s7 }
 0x2b5   :  { %p419_p7 = pnand %p417_p6, %p414_p5 }
 0x2b7   :  { %422 = shalt.err (!%p419_p7)
}
 0x2b8   :  { %310 = dma.vmem_to_hbm [thread:$0]  %s308_s30, 16, %s546_s7, [#allocation4]  }
 0x2b9   :  { %423 = dma.done.wait [#allocation4], 16  }
 0x2ba   :  { %424 = vsyncadd [#allocation4], 4294967280 }
 0x2bb   :  { %314 = vsyncpa [#allocation4], 1 }

</bundles_post_ra>
